<compile_context>
chip_gen: v5e
topology: v5e:2x2
jax: 0.10.0
libtpu: 0.0.40
codegen_flags: <defaults>
</compile_context>

<pallas_src>
import math

import jax
import jax.numpy as jnp
from jax.experimental import pallas as pl
from jax.experimental.pallas import tpu as pltpu


def _scale_kernel(x_ref, gamma_ref, o_ref):
    # x_ref: (TM, W) tile; gamma_ref: (1, W) -> broadcasts over the rows
    # (sublanes). Pure VPU elementwise multiply; mem-bound.
    o_ref[...] = x_ref[...] * gamma_ref[...]


def layer_scale(x: jax.Array, gamma: jax.Array) -> jax.Array:
    """LayerScale forward: x * gamma, gamma broadcast over the last dim."""
    orig_shape = x.shape
    D = orig_shape[-1]
    assert gamma.shape == (D,), "gamma must have shape (dim,)"
    gamma = gamma.astype(x.dtype)
    total = math.prod(orig_shape)
    itemsize = jnp.dtype(x.dtype).itemsize

    # Lane-dense width: must be a multiple of D (so the tiled-gamma broadcast
    # pattern is exact) and of 128 (full lane width, unmasked stores).
    base = (D * 128) // math.gcd(D, 128)  # lcm(D, 128)

    if total % base == 0:
        # Widest W <= 4096 that is a multiple of `base` and divides total.
        W = base
        while W * 2 <= 4096 and total % (W * 2) == 0:
            W *= 2
        R = total // W

        # ~2 MiB per x tile: 2x-buffered input + output = ~8 MiB live VMEM,
        # comfortably under the 32 MiB scoped limit on every generation.
        tm_target = max(8, ((2 << 20) // (W * itemsize)) // 8 * 8)
        TM = R if R <= tm_target else tm_target
        grid = (pl.cdiv(R, TM),)

        x2 = x.reshape(R, W)
        gamma2 = jnp.tile(gamma, W // D).reshape(1, W)

        out = pl.pallas_call(
            _scale_kernel,
            out_shape=jax.ShapeDtypeStruct((R, W), x.dtype),
            grid=grid,
            in_specs=[
                pl.BlockSpec((TM, W), lambda i: (i, 0)),
                # Constant block index -> gamma stays resident in VMEM.
                pl.BlockSpec((1, W), lambda i: (0, 0)),
            ],
            out_specs=pl.BlockSpec((TM, W), lambda i: (i, 0)),
            compiler_params=pltpu.CompilerParams(
                dimension_semantics=("parallel",),
            ),
        )(x2, gamma2)
        return out.reshape(orig_shape)

    # Fallback (total not divisible by lcm(D, 128)): 2D view with the natural
    # last dim; block row count is a multiple of 8 (or the full extent).
    R = total // D
    x2 = x.reshape(R, D)
    gamma2 = gamma.reshape(1, D)
    tm_target = max(8, ((2 << 20) // (D * itemsize)) // 8 * 8)
    TM = R if R <= tm_target else tm_target
    out = pl.pallas_call(
        _scale_kernel,
        out_shape=jax.ShapeDtypeStruct((R, D), x.dtype),
        grid=(pl.cdiv(R, TM),),
        in_specs=[
            pl.BlockSpec((TM, D), lambda i: (i, 0)),
            pl.BlockSpec((1, D), lambda i: (0, 0)),
        ],
        out_specs=pl.BlockSpec((TM, D), lambda i: (i, 0)),
        compiler_params=pltpu.CompilerParams(
            dimension_semantics=("parallel",),
        ),
    )(x2, gamma2)
    return out.reshape(orig_shape)


if __name__ == "__main__":
    # Module config: LayerScale(dim, init_values) -> gamma = init_values * ones(dim)
    dim = 32
    init_values = 1e-05
    gamma = init_values * jnp.ones((dim,), dtype=jnp.float32)

    key = jax.random.PRNGKey(0)

    # Primary small example: (batch=2, seq=8, hidden=dim), channels-last.
    x = jax.random.normal(key, (2, 8, dim), dtype=jnp.float32)
    out = jax.block_until_ready(layer_scale(x, gamma))
    ref = x * gamma
    assert out.shape == x.shape and out.dtype == x.dtype
    assert jnp.allclose(out, ref, atol=1e-6, rtol=1e-6)

    # Secondary check: slightly longer sequence exercises the tiled-gamma
    # lane-dense path with a wider W.
    x2 = jax.random.normal(jax.random.PRNGKey(1), (2, 64, dim), dtype=jnp.float32)
    out2 = jax.block_until_ready(layer_scale(x2, gamma))
    assert jnp.allclose(out2, x2 * gamma, atol=1e-6, rtol=1e-6)

    print("KERNEL_OK")
</pallas_src>

<mosaic_0001>
module attributes {stable_mosaic.version = 11 : i64} {
  func.func @_scale_kernel(%arg0: i32, %arg1: memref<1x512xf32, #tpu.memory_space<vmem>>, %arg2: memref<1x512xf32, #tpu.memory_space<vmem>>, %arg3: memref<1x512xf32, #tpu.memory_space<vmem>>) attributes {dimension_semantics = [#tpu.dimension_semantics<parallel>], iteration_bounds = array<i64: 1>, scalar_prefetch = 0 : i64, scratch_operands = 0 : i64, tpu.core_type = #tpu.core_type<tc>, window_params = [{transform_indices = @transform_0, window_bounds = array<i64: 1, 512>}, {pipeline_mode = #tpu.pipeline_mode<synchronous>, transform_indices = @transform_1, window_bounds = array<i64: 1, 512>}, {transform_indices = @transform_2, window_bounds = array<i64: 1, 512>}]} {
    %c0 = arith.constant 0 : index
    %c0_0 = arith.constant 0 : index
    %0 = vector.load %arg1[%c0, %c0_0] : memref<1x512xf32, #tpu.memory_space<vmem>>, vector<1x512xf32>
    %c0_1 = arith.constant 0 : index
    %c0_2 = arith.constant 0 : index
    %1 = vector.load %arg2[%c0_1, %c0_2] : memref<1x512xf32, #tpu.memory_space<vmem>>, vector<1x512xf32>
    %2 = arith.mulf %0, %1 : vector<1x512xf32>
    %c0_3 = arith.constant 0 : index
    %c0_4 = arith.constant 0 : index
    %3 = vector.load %arg3[%c0_3, %c0_4] : memref<1x512xf32, #tpu.memory_space<vmem>>, vector<1x512xf32>
    tpu.vector_store %arg3[%c0_3, %c0_4], %2 {strides = array<i32>} : memref<1x512xf32, #tpu.memory_space<vmem>>, vector<1x512xf32>,
    return
  }
  func.func @transform_0(%arg0: i32) -> (i32, i32) {
    %c0_i32 = arith.constant 0 : i32
    %c0_i32_0 = arith.constant 0 : i32
    return %arg0, %c0_i32 : i32, i32
  }
  func.func @transform_1(%arg0: i32) -> (i32, i32) {
    %c0_i32 = arith.constant 0 : i32
    %c0_i32_0 = arith.constant 0 : i32
    %c0_i32_1 = arith.constant 0 : i32
    return %c0_i32, %c0_i32_0 : i32, i32
  }
  func.func @transform_2(%arg0: i32) -> (i32, i32) {
    %c0_i32 = arith.constant 0 : i32
    %c0_i32_0 = arith.constant 0 : i32
    return %arg0, %c0_i32 : i32, i32
  }
}

</mosaic_0001>

<bundles_post_ra>
// kernel: tpu_custom_call.1
= control target key start
LH: loop header
LB: loop body
LE: loop exit
PB: predicated region body
PF: predicated region fallthrough
CT: control target
= control target key end

     0   :  { %7 = vsyncpa [#allocation3], 0  ;;  %s174_s0 = inlined_call_operand.hbm [shape: f32[1,512], index: 0, kind: input, shape index: {}]   ;;  %s175_s1 = inlined_call_operand.hbm [shape: f32[1,512], index: 1, kind: input, shape index: {}]   ;;  %s176_s2 = inlined_call_operand.hbm [shape: f32[1,512], index: 2, kind: output, shape index: {}]  }
   0x1   :  { %8 = vsyncpa [#allocation6], 0 }
   0x2   :  { %9 = vsyncpa [#allocation4], 0  ;;  %s15_s11 = sshll.u32 %s174_s0, 4  ;;  %s147_s12 = smov [#allocation2]   ;;  %s16_s11 = int_to_ptr.hbm [resolvable:$true] %s15_s11 }
   0x3   :  { %s17_s13 = sshll.u32 %s147_s12, 4  ;;  %s26_s16 = sshll.u32 %s175_s1, 4  ;;  %s18_s13 = int_to_ptr.vmem [resolvable:$true] %s17_s13  ;;  %s27_s16 = int_to_ptr.hbm [resolvable:$true] %s26_s16 }
   0x4   :  { %20 = dma.hbm_to_vmem [thread:$0]  %s16_s11, 64, %s18_s13, [#allocation3]  }
   0x5   :  { %s148_s17 = smov [#allocation5]  }
   0x6   :  { %s28_s18 = sshll.u32 %s148_s17, 4  ;;  %s29_s18 = int_to_ptr.vmem [resolvable:$true] %s28_s18 }
   0x7   :  { %31 = dma.hbm_to_vmem [thread:$0]  %s27_s16, 64, %s29_s18, [#allocation6]  }
   0x8   :  { %141 = dma.done.wait [#allocation3], 64  }
   0x9   :  { %142 = vsyncadd [#allocation3], 4294967232 }
   0xa   :  { %143 = dma.done.wait [#allocation6], 64  }
   0xb   :  { %144 = vsyncadd [#allocation6], 4294967232  ;;  %v43_v0 = vlaneseq  ;;  %s149_s0 = smov [#allocation7]   ;;  %s55_s22 = sshll.u32 %s176_s2, 4  ;;  %v40_v1 = vld [vmem:[#allocation2] sm:$0xf]  ;;  %s56_s22 = int_to_ptr.hbm [resolvable:$true] %s55_s22 }
   0xc   :  { %s53_s19 = sshll.u32 %s149_s0, 4  ;;  %v41_v2 = vld [vmem:[#allocation5] sm:$0xf]  ;;  %s54_s19 = int_to_ptr.vmem [resolvable:$true] %s53_s19 }
   0xd   :  { %vm45_vm0 = vcmp.lt.s32.totalorder %v43_v0, 512  ;;  %v42_v3 = vmul.f32 %v41_v2, %v40_v1 }
   0xf   :  { %47 = vst.msk [vmem:[#allocation7] sm:$0xf] %vm45_vm0, %v42_v3 }
  0x10   :  { %58 = dma.vmem_to_hbm [thread:$0]  %s54_s19, 64, %s56_s22, [#allocation4]  }
  0x11   :  { %145 = dma.done.wait [#allocation4], 64  }
  0x12   :  { %146 = vsyncadd [#allocation4], 4294967232 }
  0x13   :  { %63 = vsyncpa [#allocation3], 1 }
  0x14   :  { %64 = vsyncpa [#allocation6], 1 }
  0x15   :  { %65 = vsyncpa [#allocation4], 1 }

</bundles_post_ra>
